<compile_context>
chip_gen: v6e
topology: v6e:2x2x1
jax: 0.10.0
libtpu: 0.0.40
codegen_flags: <defaults>
</compile_context>

<pallas_src>
import functools

import jax
import jax.numpy as jnp
from jax import lax
from jax.experimental import pallas as pl
from jax.experimental.pallas import tpu as pltpu

n_embd = 384
dropout_p = 0.2  # eval-mode identity (see TODO in kernel)


def head_kernel(x_ref, w_ref, o_ref, *, bb, T, H):
    """One grid step processes `bb` whole sequences of length T.

    x_ref: (bb*T, C)   activations, batch-major (row r belongs to sequence r // T)
    w_ref: (C, 3H)     fused [k | q | v] projection weight (bf16)
    o_ref: (bb*T, H)   attention output
    """
    rows, C = x_ref.shape

    # Single fused QKV projection on the MXU (one N=3H pass instead of three
    # narrow N=H passes, one weight DMA); bf16 inputs, f32 accumulation.
    x = x_ref[...].astype(jnp.bfloat16)
    kqv = jnp.dot(x, w_ref[...], preferred_element_type=jnp.float32)  # (rows, 3H)

    # Split k/q/v and restore per-sequence structure.  (rows, H) -> (bb, T, H)
    # only splits the sublane axis (no lane movement).
    k = kqv[:, 0 * H:1 * H].reshape(bb, T, H).astype(jnp.bfloat16)
    q = kqv[:, 1 * H:2 * H].reshape(bb, T, H).astype(jnp.bfloat16)
    v = kqv[:, 2 * H:3 * H].reshape(bb, T, H).astype(jnp.bfloat16)

    # Batched scores (bb, T, T): contract the H axes directly (no materialized
    # k.T) and scale by C**-0.5 exactly as the PyTorch module does.
    scale = float(C) ** -0.5
    s = jnp.einsum('bqd,bkd->bqk', q, k,
                   preferred_element_type=jnp.float32) * scale

    # (T, T) causal mask broadcast over the bb sequences.  Large finite
    # negative (not -inf) so exp never produces NaN.
    r = lax.broadcasted_iota(jnp.int32, (T, T), 0)
    c = lax.broadcasted_iota(jnp.int32, (T, T), 1)
    s = jnp.where((c <= r)[None, :, :], s, -1e30)

    # Numerically-stable softmax, all in f32 (v5e has no bf16 VPU/EUP path).
    # pl.reciprocal(approx=True) runs on the EUP slot (nearly free).
    m = jnp.max(s, axis=-1, keepdims=True)
    e = jnp.exp(s - m)
    w = e * pl.reciprocal(jnp.sum(e, axis=-1, keepdims=True), approx=True)

    # TODO(synk): nn.Dropout(p=0.2) on the attention weights is eval-mode
    # identity here; training-mode parity would use pltpu.prng_seed +
    # pltpu.stateful_bernoulli on `w`.

    out = jnp.einsum('bqk,bkd->bqd', w.astype(jnp.bfloat16), v,
                     preferred_element_type=jnp.float32)        # (bb, T, H)

    # TODO(synk): H=64 < 128 lanes -> masked output stores.  A lane-dense
    # output requires fusing all heads of the surrounding multi-head layer
    # into one kernel (last dim = n_heads*H); this module is a single Head,
    # so its interface caps the output at H lanes.
    o_ref[...] = out.reshape(rows, H).astype(o_ref.dtype)


def fuse_qkv_weight(wk, wq, wv):
    """Build the fused (C, 3H) bf16 projection weight ONCE, outside jit."""
    return jnp.concatenate([wk, wq, wv], axis=1).astype(jnp.bfloat16)


def _pick_bb(B, T, target_rows=256):
    """Largest divisor bb of B such that rows = bb*T
       - respects the sublane rule (rows % 8 == 0, or bb == B -> full block),
       - fits the MXU row target (256 fills v6e/v7x; two passes on v5e),
       - and, when possible, leaves grid = B // bb >= 2 so both v7x TCs work.
    """
    divisors = [d for d in range(1, B + 1) if B % d == 0]
    legal = [d for d in divisors if (d * T) % 8 == 0 or d == B]
    for want_two_steps in (True, False):
        cands = [d for d in legal
                 if d * T <= target_rows and (not want_two_steps or B // d >= 2)]
        if cands:
            return max(cands)
    return min(legal)   # nothing fits the row target; smallest legal tile


@jax.jit
def head_forward(x, w_kqv):
    """x: (B, T, C) float32, w_kqv: (C, 3H) fused bf16 weight -> (B, T, H)."""
    B, T, C = x.shape
    H = w_kqv.shape[1] // 3

    bb = _pick_bb(B, T)
    rows = bb * T
    x2d = x.reshape(B * T, C)   # contiguous row-major reshape: free, outside kernel

    out2d = pl.pallas_call(
        functools.partial(head_kernel, bb=bb, T=T, H=H),
        out_shape=jax.ShapeDtypeStruct((B * T, H), x.dtype),
        grid_spec=pltpu.PrefetchScalarGridSpec(
            num_scalar_prefetch=0,
            grid=(B // bb,),
            in_specs=[
                pl.BlockSpec((rows, C), lambda i: (i, 0)),
                pl.BlockSpec((C, 3 * H), lambda i: (0, 0)),
            ],
            out_specs=pl.BlockSpec((rows, H), lambda i: (i, 0)),
        ),
        compiler_params=pltpu.CompilerParams(
            dimension_semantics=("parallel",)),
    )(x2d, w_kqv)
    return out2d.reshape(B, T, H)


if __name__ == "__main__":
    # Small shapes consistent with the module: C must be n_embd (=384).
    B, T, H = 2, 16, 64
    key = jax.random.PRNGKey(0)
    kx, kk, kq, kv = jax.random.split(key, 4)

    x = jax.random.normal(kx, (B, T, n_embd), dtype=jnp.float32)

    # Deterministic nn.Linear-style init: U(-1/sqrt(n_embd), 1/sqrt(n_embd)),
    # stored already transposed to (n_embd, head_size).
    bound = 1.0 / (n_embd ** 0.5)
    wk = jax.random.uniform(kk, (n_embd, H), jnp.float32, -bound, bound)
    wq = jax.random.uniform(kq, (n_embd, H), jnp.float32, -bound, bound)
    wv = jax.random.uniform(kv, (n_embd, H), jnp.float32, -bound, bound)

    # Fused bf16 weight built once, outside the jitted forward (hoisted).
    w_kqv = jax.block_until_ready(fuse_qkv_weight(wk, wq, wv))

    out = head_forward(x, w_kqv)
    jax.block_until_ready(out)

    # Pure-JAX f32 reference. The kernel feeds the MXU bf16 inputs (with f32
    # accumulation and f32 softmax), hence the relaxed tolerance.
    k = x @ wk
    q = x @ wq
    v = x @ wv
    s = (q @ jnp.swapaxes(k, -1, -2)) * (n_embd ** -0.5)
    mask = jnp.tril(jnp.ones((T, T), dtype=bool))
    s = jnp.where(mask[None], s, -jnp.inf)
    ref = jax.nn.softmax(s, axis=-1) @ v
    assert jnp.allclose(out, ref, atol=3e-2, rtol=3e-2), float(
        jnp.max(jnp.abs(out - ref)))

    print("KERNEL_OK")
</pallas_src>

<mosaic_0001>
module attributes {stable_mosaic.version = 11 : i64} {
  func.func @head_kernel(%arg0: i32, %arg1: memref<16x384xf32, #tpu.memory_space<vmem>>, %arg2: memref<384x192xbf16, #tpu.memory_space<vmem>>, %arg3: memref<16x64xf32, #tpu.memory_space<vmem>>) attributes {dimension_semantics = [#tpu.dimension_semantics<parallel>], iteration_bounds = array<i64: 2>, scalar_prefetch = 0 : i64, scratch_operands = 0 : i64, tpu.core_type = #tpu.core_type<tc>, window_params = [{transform_indices = @transform_0, window_bounds = array<i64: 16, 384>}, {pipeline_mode = #tpu.pipeline_mode<synchronous>, transform_indices = @transform_1, window_bounds = array<i64: 384, 192>}, {transform_indices = @transform_2, window_bounds = array<i64: 16, 64>}]} {
    %c0 = arith.constant 0 : index
    %c0_0 = arith.constant 0 : index
    %0 = vector.load %arg1[%c0, %c0_0] : memref<16x384xf32, #tpu.memory_space<vmem>>, vector<16x384xf32>
    %1 = arith.truncf %0 : vector<16x384xf32> to vector<16x384xbf16>
    %c0_1 = arith.constant 0 : index
    %c0_2 = arith.constant 0 : index
    %2 = vector.load %arg2[%c0_1, %c0_2] : memref<384x192xbf16, #tpu.memory_space<vmem>>, vector<384x192xbf16>
    %cst = arith.constant dense<0.000000e+00> : vector<16x192xf32>
    %3 = tpu.matmul %1, %2, %cst {dimension_numbers = #tpu.dot_dimension_numbers<[1], [0], [0], [1], [0, 0, 1, 1], [], []>} : vector<16x384xbf16>, vector<384x192xbf16>, vector<16x192xf32> -> vector<16x192xf32>
    %4 = vector.extract_strided_slice %3 {offsets = [0, 0], sizes = [16, 64], strides = [1, 1]} : vector<16x192xf32> to vector<16x64xf32>
    %5 = vector.shape_cast %4 : vector<16x64xf32> to vector<1x16x64xf32>
    %6 = arith.truncf %5 : vector<1x16x64xf32> to vector<1x16x64xbf16>
    %7 = vector.extract_strided_slice %3 {offsets = [0, 64], sizes = [16, 64], strides = [1, 1]} : vector<16x192xf32> to vector<16x64xf32>
    %8 = vector.shape_cast %7 : vector<16x64xf32> to vector<1x16x64xf32>
    %9 = arith.truncf %8 : vector<1x16x64xf32> to vector<1x16x64xbf16>
    %10 = vector.extract_strided_slice %3 {offsets = [0, 128], sizes = [16, 64], strides = [1, 1]} : vector<16x192xf32> to vector<16x64xf32>
    %11 = vector.shape_cast %10 : vector<16x64xf32> to vector<1x16x64xf32>
    %12 = arith.truncf %11 : vector<1x16x64xf32> to vector<1x16x64xbf16>
    "tpu.trace_start"() <{level = 10 : i32, message = "bqd,bkd->bqk"}> : () -> ()
    %cst_3 = arith.constant dense<0.000000e+00> : vector<1x16x16xf32>
    %13 = tpu.matmul %9, %6, %cst_3 {dimension_numbers = #tpu.dot_dimension_numbers<[2], [2], [1], [1], [0, 0, 0, 1, 1, 1], [0], [0]>} : vector<1x16x64xbf16>, vector<1x16x64xbf16>, vector<1x16x16xf32> -> vector<1x16x16xf32>
    "tpu.trace_stop"() : () -> ()
    %cst_4 = arith.constant 0.0510310382 : f32
    %14 = vector.broadcast %cst_4 : f32 to vector<1x16x16xf32>
    %15 = arith.mulf %13, %14 : vector<1x16x16xf32>
    %16 = tpu.iota {dimensions = array<i32: 0>} : vector<16x16xi32>
    %17 = tpu.iota {dimensions = array<i32: 1>} : vector<16x16xi32>
    %18 = arith.cmpi sle, %17, %16 : vector<16x16xi32>
    %19 = vector.shape_cast %18 : vector<16x16xi1> to vector<1x16x16xi1>
    %cst_5 = arith.constant -1.000000e+30 : f32
    %20 = vector.broadcast %cst_5 : f32 to vector<1x16x16xf32>
    %21 = arith.select %19, %15, %20 : vector<1x16x16xi1>, vector<1x16x16xf32>
    %cst_6 = arith.constant dense<0xFF800000> : vector<1x16xf32>
    %22 = vector.multi_reduction <maximumf>, %21, %cst_6 [2] : vector<1x16x16xf32> to vector<1x16xf32>
    %23 = vector.shape_cast %22 : vector<1x16xf32> to vector<1x16x1xf32>
    %24 = vector.broadcast %23 : vector<1x16x1xf32> to vector<1x16x16xf32>
    %25 = arith.subf %21, %24 : vector<1x16x16xf32>
    %26 = math.exp %25 : vector<1x16x16xf32>
    %cst_7 = arith.constant dense<0.000000e+00> : vector<1x16xf32>
    %27 = vector.multi_reduction <add>, %26, %cst_7 [2] : vector<1x16x16xf32> to vector<1x16xf32>
    %28 = vector.shape_cast %27 : vector<1x16xf32> to vector<1x16x1xf32>
    %29 = tpu.reciprocal %28 {approx = true} : vector<1x16x1xf32> -> vector<1x16x1xf32>
    %30 = vector.broadcast %29 : vector<1x16x1xf32> to vector<1x16x16xf32>
    %31 = arith.mulf %26, %30 : vector<1x16x16xf32>
    %32 = arith.truncf %31 : vector<1x16x16xf32> to vector<1x16x16xbf16>
    "tpu.trace_start"() <{level = 10 : i32, message = "bqk,bkd->bqd"}> : () -> ()
    %cst_8 = arith.constant dense<0.000000e+00> : vector<1x16x64xf32>
    %33 = tpu.matmul %32, %12, %cst_8 {dimension_numbers = #tpu.dot_dimension_numbers<[2], [1], [1], [2], [0, 0, 0, 1, 1, 2], [0], [0]>} : vector<1x16x16xbf16>, vector<1x16x64xbf16>, vector<1x16x64xf32> -> vector<1x16x64xf32>
    "tpu.trace_stop"() : () -> ()
    %34 = vector.shape_cast %33 : vector<1x16x64xf32> to vector<16x64xf32>
    %c0_9 = arith.constant 0 : index
    %c0_10 = arith.constant 0 : index
    %35 = vector.load %arg3[%c0_9, %c0_10] : memref<16x64xf32, #tpu.memory_space<vmem>>, vector<16x64xf32>
    tpu.vector_store %arg3[%c0_9, %c0_10], %34 {strides = array<i32>} : memref<16x64xf32, #tpu.memory_space<vmem>>, vector<16x64xf32>,
    return
  }
  func.func @transform_0(%arg0: i32) -> (i32, i32) {
    %c0_i32 = arith.constant 0 : i32
    %c0_i32_0 = arith.constant 0 : i32
    return %arg0, %c0_i32 : i32, i32
  }
  func.func @transform_1(%arg0: i32) -> (i32, i32) {
    %c0_i32 = arith.constant 0 : i32
    %c0_i32_0 = arith.constant 0 : i32
    %c0_i32_1 = arith.constant 0 : i32
    return %c0_i32, %c0_i32_0 : i32, i32
  }
  func.func @transform_2(%arg0: i32) -> (i32, i32) {
    %c0_i32 = arith.constant 0 : i32
    %c0_i32_0 = arith.constant 0 : i32
    return %arg0, %c0_i32 : i32, i32
  }
}

</mosaic_0001>

<bundles_post_ra>
// kernel: head_forward.1
= control target key start
LH: loop header
LB: loop body
LE: loop exit
PB: predicated region body
PF: predicated region fallthrough
CT: control target
= control target key end

     0   :  { %7 = vsyncpa [#allocation3], 0  ;;  %s1295_s0 = inlined_call_operand.vmem [shape: f32[32,384], index: 0, kind: input, shape index: {}]   ;;  %s1296_s1 = inlined_call_operand.vmem [shape: bf16[384,192], index: 1, kind: input, shape index: {}]   ;;  %s1297_s2 = inlined_call_operand.hbm [shape: f32[32,64], index: 2, kind: output, shape index: {}]  }
   0x1   :  { %9 = vsyncpa [#allocation3 + $0x1], 0  ;;  %s1031_s9 = smov 0   ;;  %s1033_s10 = smov 0  }
   0x2   :  { %s1035_s11 = smov 0   ;;  %s1037_s12 = smov 0  }
   0x3 LB: > { %s1052_s13 = sadd.s32 4294967295, %s1007_s12   ;;  %s742_s14 = sadd.s32 4294967294, %s1007_s12   ;;  %s1007_s12 = sphi %s1037_s12, %s1303_s12   ;;  %s1003_s11 = sphi %s1035_s11, %s1302_s11   ;;  %s999_s10 = sphi %s1033_s10, %s1301_s10   ;;  %s995_s9 = sphi %s1031_s9, %s1300_s9  }
   0x4   : > { %s1056_s15 = sadd.s32 1, %s1007_s12   ;;  %s69_s16 = sadd.s32 1, %s1003_s11 }
   0x5   : > { %s66_s17 = ssub.s32 %s1007_s12, %s1056_s15  ;;  %p79_p0 = scmp.ne.s32.totalorder %s1003_s11, %s999_s10 }
   0x6   : > { %p67_p1 = scmp.eq.s32.totalorder %s66_s17, 0  ;;  %p80_p2 = scmp.eq.s32.totalorder %s1052_s13, 1 }
   0x7   : > { %p85_p3 = scmp.ne.s32.totalorder %s999_s10, %s995_s9  ;;  %p86_p4 = scmp.eq.s32.totalorder %s742_s14, 1 }
   0x8   : > { %s1067_s18 = scalar_select %p67_p1, %s1003_s11, %s69_s16  }
   0x9   : > { %p1069_p5 = por %p80_p2, %p79_p0  ;;  %p1073_p6 = por %p86_p4, %p85_p3 }
   0xa   : > { %p745_p7 = scmp.ge.s32.totalorder %s1007_s12, 1  ;;  %p117_p8 = scmp.lt.s32.totalorder %s1007_s12, 3 }
   0xc   : > { %p118_p9 = pnand %p745_p7, %p117_p8 }
   0xd   : > { %s747_s6 = sshll.u32 (!%p118_p9), %s1052_s13, 1  ;;  %s804_s5 = sshll.u32 (!%p118_p9), %s1052_s13, 8 }
   0xe   : > { %121 = sbr.rel (%p118_p9) target bundleno = 1126 (0x466), region = 28  ;;  %p141_p10 = scmp.lt.s32.totalorder (!%p118_p9), %s747_s6, 3 }
   0xf   : > { %s1252_s14 = scalar_lea.hbm (!%p118_p9), %s1297_s2, %s804_s5 }
  0x13   : > { %v867_v0 = vld [vmem:[%s1296_s1 + $0x74] ss:$8 sps:$4 sm:$0xff]   ;;  %v869_v1 = vld [vmem:[%s1296_s1 + $0x70] ss:$8 sps:$4 sm:$0xff]   ;;  %v1009_v2 = vmov 0   ;;  %s1305_s6 = smov (!%p141_p10, %s747_s6), 3 }
  0x14   : > { %521 = vmatprep.mubr.bf16.mxu1 %v1009_v2  ;;  %446 = vmatprep.subr.bf16.mxu0 %v867_v0  ;;  %v870_v3 = vld [vmem:[%s1296_s1 + $0x64] ss:$8 sps:$4 sm:$0xff]   ;;  %v872_v4 = vld [vmem:[%s1296_s1 + $0x60] ss:$8 sps:$4 sm:$0xff]   ;;  %v873_v5 = vld [vmem:[%s1296_s1 + $0x54] ss:$8 sps:$4 sm:$0xff]  }
  0x15   : > { %447 = vmatpush1.bf16.msra.mxu0 %v869_v1  ;;  %v875_v6 = vld [vmem:[%s1296_s1 + $0x50] ss:$8 sps:$4 sm:$0xff]   ;;  %v876_v7 = vld [vmem:[%s1296_s1 + $0x44] ss:$8 sps:$4 sm:$0xff]   ;;  %v888_v8 = vld [vmem:[%s1296_s1 + $0x174] ss:$8 sps:$4 sm:$0xff]  }
  0x16   : > { %448 = vmatprep.subr.bf16.mxu0 %v870_v3  ;;  %v890_v9 = vld [vmem:[%s1296_s1 + $0x170] ss:$8 sps:$4 sm:$0xff]   ;;  %v878_v10 = vld [vmem:[%s1296_s1 + $0x40] ss:$8 sps:$4 sm:$0xff]   ;;  %v879_v11 = vld [vmem:[%s1296_s1 + $0x34] ss:$8 sps:$4 sm:$0xff]   ;;  %489 = vmatprep.subr.bf16.mxu1 %v888_v8 }
  0x17   : > { %v894_v12 = vld [vmem:[%s1296_s1 + $0x164] ss:$8 sps:$4 sm:$0xff]   ;;  %490 = vmatpush1.bf16.msra.mxu1 %v890_v9  ;;  %v896_v13 = vld [vmem:[%s1296_s1 + $0x160] ss:$8 sps:$4 sm:$0xff]   ;;  %v881_v14 = vld [vmem:[%s1296_s1 + $0x30] ss:$8 sps:$4 sm:$0xff]  }
  0x18   : > { %491 = vmatprep.subr.bf16.mxu1 %v894_v12  ;;  %v900_v15 = vld [vmem:[%s1296_s1 + $0x154] ss:$8 sps:$4 sm:$0xff]   ;;  %v882_v16 = vld [vmem:[%s1296_s1 + $0x24] ss:$8 sps:$4 sm:$0xff]   ;;  %v902_v17 = vld [vmem:[%s1296_s1 + $0x150] ss:$8 sps:$4 sm:$0xff]  }
  0x19   : > { %449 = vmatpush1.bf16.msra.mxu0 %v872_v4  ;;  %v906_v18 = vld [vmem:[%s1296_s1 + $0x144] ss:$8 sps:$4 sm:$0xff]   ;;  %v884_v19 = vld [vmem:[%s1296_s1 + $0x20] ss:$8 sps:$4 sm:$0xff]   ;;  %v885_v20 = vld [vmem:[%s1296_s1 + $0x14] ss:$8 sps:$4 sm:$0xff]  }
  0x1a   : > { %450 = vmatprep.subr.bf16.mxu0 %v873_v5  ;;  %v908_v21 = vld [vmem:[%s1296_s1 + $0x140] ss:$8 sps:$4 sm:$0xff]   ;;  %v912_v22 = vld [vmem:[%s1296_s1 + $0x134] ss:$8 sps:$4 sm:$0xff]   ;;  %v887_v23 = vld [vmem:[%s1296_s1 + $0x10] ss:$8 sps:$4 sm:$0xff]  }
  0x1b   : > { %492 = vmatpush1.bf16.msra.mxu1 %v896_v13  ;;  %v891_v24 = vld [vmem:[%s1296_s1 + $0x4] ss:$8 sps:$4 sm:$0xff]   ;;  %v914_v25 = vld [vmem:[%s1296_s1 + $0x130] ss:$8 sps:$4 sm:$0xff]   ;;  %v893_v27 = vld [vmem:[%s1296_s1] ss:$8 sps:$4 sm:$0xff]  }
  0x1c   : > { %493 = vmatprep.subr.bf16.mxu1 %v900_v15  ;;  %v918_v26 = vld [vmem:[%s1296_s1 + $0x124] ss:$8 sps:$4 sm:$0xff]   ;;  %s821_s17 = smul.u32 24, %s1305_s6  ;;  %v897_v28 = vld [vmem:[%s1296_s1 + $0xf4] ss:$8 sps:$4 sm:$0xff]   ;;  %v1010_v58 = vmov 0.0  }
  0x1d   : > { %451 = vmatpush1.bf16.msra.mxu0 %v875_v6  ;;  %v920_v29 = vld [vmem:[%s1296_s1 + $0x120] ss:$8 sps:$4 sm:$0xff]   ;;  %v924_v30 = vld [vmem:[%s1296_s1 + $0x114] ss:$8 sps:$4 sm:$0xff]   ;;  %v899_v31 = vld [vmem:[%s1296_s1 + $0xf0] ss:$8 sps:$4 sm:$0xff]  }
  0x1e   : > { %452 = vmatprep.subr.bf16.mxu0 %v876_v7  ;;  %s1176_s30 = scalar_lea.vmem %s1295_s0, %s821_s17  ;;  %v903_v32 = vld [vmem:[%s1296_s1 + $0xe4] ss:$8 sps:$4 sm:$0xff]   ;;  %v926_v34 = vld [vmem:[%s1296_s1 + $0x110] ss:$8 sps:$4 sm:$0xff]   ;;  %v905_v38 = vld [vmem:[%s1296_s1 + $0xe0] ss:$8 sps:$4 sm:$0xff]  }
  0x1f   : > { %494 = vmatpush1.bf16.msra.mxu1 %v902_v17  ;;  %v150_v33 = vld [vmem:[%s1176_s30 + $0x8] sm:$0xff]  ;;  %v153_v35 = vld [vmem:[%s1176_s30 + $0x20] sm:$0xff]  ;;  %v909_v39 = vld [vmem:[%s1296_s1 + $0xd4] ss:$8 sps:$4 sm:$0xff]   ;;  %vm1011_vm0 = vmmov 0   ;;  %vm537_vm1 = vcmask 523264  }
  0x20   : > { %495 = vmatprep.subr.bf16.mxu1 %v906_v18  ;;  %v930_v36 = vld [vmem:[%s1296_s1 + $0x104] ss:$8 sps:$4 sm:$0xff]   ;;  %v156_v37 = vpack.c.bf16 %v153_v35, %v150_v33  ;;  %v932_v40 = vld [vmem:[%s1296_s1 + $0x100] ss:$8 sps:$4 sm:$0xff]   ;;  %v151_v41 = vld [vmem:[%s1176_s30 + $0x10] sm:$0xff]  ;;  %vm596_vm3 = vcmask 130048  }
  0x21   : > { %453 = vmatpush1.bf16.msra.mxu0 %v878_v10  ;;  %v154_v42 = vld [vmem:[%s1176_s30 + $0x28] sm:$0xff]  ;;  %v911_v43 = vld [vmem:[%s1296_s1 + $0xd0] ss:$8 sps:$4 sm:$0xff]   ;;  %v921_v47 = vld [vmem:[%s1296_s1 + $0xb4] ss:$8 sps:$4 sm:$0xff]   ;;  %s137_s6 = sand.u32 1, %s999_s10  }
  0x22   : > { %454 = vmatprep.subr.bf16.mxu0 %v879_v11  ;;  %478 = vmatprep.mubr.bf16.mxu0 %v156_v37  ;;  %v915_v44 = vld [vmem:[%s1296_s1 + $0xc4] ss:$8 sps:$4 sm:$0xff]   ;;  %v157_v45 = vpack.c.bf16 %v154_v42, %v151_v41  ;;  %v917_v46 = vld [vmem:[%s1296_s1 + $0xc0] ss:$8 sps:$4 sm:$0xff]   ;;  %v923_v48 = vld [vmem:[%s1296_s1 + $0xb0] ss:$8 sps:$4 sm:$0xff]   ;;  %v587_v11 = vlaneseq }
  0x23   : > { %496 = vmatpush1.bf16.msra.mxu1 %v908_v21  ;;  %v927_v49 = vld [vmem:[%s1296_s1 + $0xa4] ss:$8 sps:$4 sm:$0xff]   ;;  %v929_v50 = vld [vmem:[%s1296_s1 + $0xa0] ss:$8 sps:$4 sm:$0xff]   ;;  %v933_v51 = vld [vmem:[%s1296_s1 + $0x94] ss:$8 sps:$4 sm:$0xff]  }
  0x24   : > { %497 = vmatprep.subr.bf16.mxu1 %v912_v22  ;;  %v935_v52 = vld [vmem:[%s1296_s1 + $0x90] ss:$8 sps:$4 sm:$0xff]   ;;  %v936_v53 = vld [vmem:[%s1296_s1 + $0x84] ss:$8 sps:$4 sm:$0xff]   ;;  %v938_v54 = vld [vmem:[%s1296_s1 + $0x80] ss:$8 sps:$4 sm:$0xff]  }
  0x25   : > { %455 = vmatpush1.bf16.msra.mxu0 %v881_v14  ;;  %v149_v55 = vld [vmem:[%s1176_s30] sm:$0xff]  ;;  %v152_v56 = vld [vmem:[%s1176_s30 + $0x18] sm:$0xff]  ;;  %s1012_s30 = smov 64   ;;  %v588_v12 = vshrl.u32 %v587_v11, 7  ;;  %v591_v13 = vand.u32 127, %v587_v11  ;;  %s746_s29 = sshll.u32 %s137_s6, 4 }
  0x26   : > { %456 = vmatprep.subr.bf16.mxu0 %v882_v16  ;;  %v155_v57 = vpack.c.bf16 %v152_v56, %v149_v55  ;;  %s139_s3 = scalar_lea.vmem [#allocation2], %s746_s29  ;;  %s1255_s16 = scalar_lea.sflag [#allocation3], %s137_s6 }
  0x27   : > { %498 = vmatpush1.bf16.msra.mxu1 %v914_v25  ;;  %vm592_vm2 = vcmp.le.s32.totalorder %v591_v13, %v588_v12  ;;  %v589_v15 = vadd.s32 8, %v588_v12  ;;  %s680_s4 = sshll.u32 %s139_s3, 4  ;;  %s1013_s17 = smov [#allocation2]   ;;  %s1247_s4 = int_to_ptr.vmem [resolvable:$true] %s680_s4 }
  0x28   : > { %499 = vmatprep.subr.bf16.mxu1 %v918_v26  ;;  %s947_s13 = scalar_lea.vmem %s1247_s4, 256  ;;  %s951_s21 = sshll.u32 %s1013_s17, 4  ;;  %s952_s21 = int_to_ptr.vmem [resolvable:$false] %s951_s21 }
  0x29   : > { %457 = vmatpush1.bf16.msra.mxu0 %v884_v19  ;;  %vm593_vm4 = vcmp.le.s32.totalorder %v591_v13, %v589_v15  ;;  %p948_p11 = scmp.ne.s32.totalorder %s1247_s4, %s947_s13  ;;  %s953_s22 = scalar_lea.vmem %s952_s21, 512 }
  0x2a   : > { %458 = vmatprep.subr.bf16.mxu0 %v885_v20  ;;  %p954_p0 = scmp.lt.s32.totalorder %s1247_s4, %s952_s21  ;;  %p955_p1 = scmp.lt.s32.totalorder %s953_s22, %s947_s13 }
  0x2b   : > { %500 = vmatpush1.bf16.msra.mxu1 %v920_v29  ;;  %p949_p12 = pnand %p948_p11, %p1069_p5 }
  0x2c   : > { %501 = vmatprep.subr.bf16.mxu1 %v924_v30  ;;  %p956_p2 = por %p955_p1, %p954_p0 }
  0x2d   : > { %459 = vmatpush1.bf16.msra.mxu0 %v887_v23  ;;  %p950_p13 = pneg %p949_p12 }
  0x2e   : > { %460 = vmatprep.subr.bf16.mxu0 %v891_v24 }
  0x2f   : > { %502 = vmatpush1.bf16.msra.mxu1 %v926_v34  ;;  %p957_p3 = pnand %p956_p2, %p950_p13 }
  0x30   : > { %503 = vmatprep.subr.bf16.mxu1 %v930_v36 }
  0x31   : > { %461 = vmatpush1.bf16.msra.mxu0 %v893_v27 }
  0x32   : > { %462 = vmatprep.subr.bf16.mxu0 %v897_v28 }
  0x33   : > { %504 = vmatpush1.bf16.msra.mxu1 %v932_v40 }
  0x34   : > { %809 = vmatprep.subr.bf16.mxu1 %v1010_v58 }
  0x35   : > { %463 = vmatpush2.bf16.msra.mxu0 %v899_v31 }
  0x36   : > { %464 = vmatprep.subr.bf16.mxu0 %v903_v32  ;;  %522 = vmatmul.mubr.bf16.vlgmr.msra.gmra.mxu1 %v157_v45 }
  0x37   : > { %811 = vmatprep.mubr.msk.bf16.mxu1 %vm1011_vm0, %v1010_v58 }
  0x39   : > { %465 = vmatpush2.bf16.msra.mxu0 %v905_v38 }
  0x3a   : > { %466 = vmatprep.subr.bf16.mxu0 %v909_v39 }
  0x3d   : > { %467 = vmatpush2.bf16.msra.mxu0 %v911_v43 }
  0x3e   : > { %468 = vmatprep.subr.bf16.mxu0 %v915_v44 }
  0x41   : > { %469 = vmatpush2.bf16.msra.mxu0 %v917_v46 }
  0x42   : > { %470 = vmatprep.subr.bf16.mxu0 %v921_v47 }
  0x45   : > { %471 = vmatpush2.bf16.msra.mxu0 %v923_v48 }
  0x46   : > { %472 = vmatprep.subr.bf16.mxu0 %v927_v49 }
  0x49   : > { %473 = vmatpush2.bf16.msra.mxu0 %v929_v50 }
  0x4a   : > { %474 = vmatprep.subr.bf16.mxu0 %v933_v51 }
  0x4d   : > { %475 = vmatpush2.bf16.msra.mxu0 %v935_v52 }
  0x4e   : > { %476 = vmatprep.subr.bf16.mxu0 %v936_v53 }
  0x51   : > { %477 = vmatpush2.bf16.msra.mxu0 %v938_v54 }
  0x54   : > { %479 = vmatmul.mubr.bf16.vlgmr.msra.gmra.mxu0 %v155_v57 }
  0xf6   : > { %v523_v59 = vpop.f32.mrf.mxu1 }
  0xf8   : > { %v525_v60 = vpop.f32.mrf.mxu1 }
  0xfa   : > { %v527_v0 = vpop.f32.mrf.mxu1 }
  0xfc   : > { %v529_v7 = vpop.f32.mrf.mxu1 }
 0x114   : > { %v480_v61 = vpop.f32.mrf.mxu0 }
 0x115   : > { %v524_v2 = vadd.f32 %v523_v59, %v480_v61 }
 0x116   : > { %v482_v62 = vpop.f32.mrf.mxu0 }
 0x117   : > { %v526_v63 = vadd.f32 %v525_v60, %v482_v62 }
 0x118   : > { %v484_v1 = vpop.f32.mrf.mxu0 }
 0x119   : > { %v528_v3 = vadd.f32 %v527_v0, %v484_v1 }
 0x11a   : > { %v486_v6 = vpop.f32.mrf.mxu0 }
 0x11b   : > { %v532_v4 = vpack.c.bf16 %v528_v3, %v524_v2  ;;  %v530_v8 = vadd.f32 %v529_v7, %v486_v6 }
 0x11d   : > { %535 = vrot.lane.b32.xlu0 %v532_v4, %s1012_s30  ;;  %v542_v5 = vsel %vm537_vm1, %v532_v4, 0  ;;  %v533_v9 = vpack.c.bf16 %v530_v8, %v526_v63 }
 0x11e   : > { %810 = vmatpush3.bf16.xpose.msra.mxu1 %v542_v5 }
 0x11f   : > { %815 = vmatprep.subr.bf16.mxu1 %v1010_v58 }
 0x18f   : > { %v536_v10 = vpop.permute.xlu0 %535 }
 0x190   : > { %812 = vmatmul.mubr.msk.bf16.vlgmr.msra.gmra.mxu1 %vm537_vm1, %v536_v10 }
 0x191   : > { %816 = vmatpush3.bf16.msra.mxu1 %v533_v9  ;;  %817 = vmatprep.mubr.msk.bf16.mxu1 %vm1011_vm0, %v1010_v58 }
 0x250   : > { %v578_v14 = vpop.f32.mrf.mxu1 }
 0x251   : > { %v585_v16 = vmul.f32 0.05103104, %v578_v14 }
 0x252   : > { %v813_v17 = vpop.f32.mrf.mxu1 }
 0x253   : > { %v594_v18 = vsel %vm592_vm2, %v585_v16, -1e+30 }
 0x254   : > { %v581_v19 = vpop.f32.mrf.mxu1  ;;  %v597_v20 = vsel %vm596_vm3, %v594_v18, -inf }
 0x255   : > { %v586_v21 = vmul.f32 0.05103104, %v581_v19  ;;  %598 = vmax.xlane.f32.xlu0 %v597_v20 }
 0x256   : > { %v814_v22 = vpop.f32.mrf.mxu1 }
 0x257   : > { %v595_v23 = vsel %vm593_vm4, %v586_v21, -1e+30 }
 0x258   : > { %v600_v24 = vsel %vm596_vm3, %v595_v23, -inf }
 0x259   : > { %601 = vmax.xlane.f32.xlu1 %v600_v24 }
 0x2de   : > { %v599_v25 = vpop.xlane.xlu0 %598 }
 0x2df   : > { %v603_v26 = vsub.f32 %v594_v18, %v599_v25 }
 0x2e1   : > { %v605_v27 = vmul.f32 1.442695, %v603_v26 }
 0x2e2   : > { %v602_v28 = vpop.xlane.xlu1 %601 }
 0x2e3   : > { %939 = vpow2.f32 %v605_v27  ;;  %v604_v29 = vsub.f32 %v595_v23, %v602_v28 }
 0x2e5   : > { %v607_v30 = vmul.f32 1.442695, %v604_v29 }
 0x2e7   : > { %941 = vpow2.f32 %v607_v30 }
 0x2f0   : > { %v940_v31 = vpop.eup %939 }
 0x2f1   : > { %v609_v32 = vsel %vm596_vm3, %v940_v31, 0.0 }
 0x2f2   : > { %610 = vadd.xlane.f32.xlu1 %v609_v32 }
 0x2f4   : > { %v942_v33 = vpop.eup %941 }
 0x2f5   : > { %v612_v34 = vsel %vm596_vm3, %v942_v33, 0.0 }
 0x2f6   : > { %613 = vadd.xlane.f32.xlu1 %v612_v34 }
 0x37b   : > { %v611_v35 = vpop.xlane.xlu1 %610 }
 0x37c   : > { %943 = vrcp.f32 %v611_v35 }
 0x37f   : > { %v614_v36 = vpop.xlane.xlu1 %613 }
 0x380   : > { %945 = vrcp.f32 %v614_v36 }
 0x389   : > { %v944_v37 = vpop.eup %943 }
 0x38a   : > { %v617_v40 = vmul.f32 %v944_v37, %v940_v31 }
 0x38d   : > { %v946_v38 = vpop.eup %945 }
 0x38e   : > { %v618_v39 = vmul.f32 %v946_v38, %v942_v33 }
 0x390   : > { %v619_v41 = vpack.c.bf16 %v618_v39, %v617_v40 }
 0x392   : > { %818 = vmatmul.mubr.msk.bf16.vlgmr.msra.gmra.mxu1 %vm596_vm3, %v619_v41 }
 0x452   : > { %v657_v42 = vpop.f32.mrf.mxu1 }
 0x453   : > { %664 = vst.msk [vmem:[%s139_s3] sm:$0xff] %vm537_vm1, %v657_v42 }
 0x454   : > { %v819_v43 = vpop.f32.mrf.mxu1 }
 0x456   : > { %v660_v44 = vpop.f32.mrf.mxu1 }
 0x457   : > { %665 = vst.msk [vmem:[%s139_s3 + $0x8] sm:$0xff] %vm537_vm1, %v660_v44 }
 0x458   : > { %v820_v45 = vpop.f32.mrf.mxu1 }
 0x459   : > { %960 = shalt.err (!%p957_p3)
}
 0x45a   : > { %s961_s23 = scalar_lea.hbm %s1252_s14, 256  ;;  %s965_s26 = scalar_lea.hbm %s1297_s2, 512 }
 0x45b   : > { %p962_p4 = scmp.ne.s32.totalorder %s1252_s14, %s961_s23  ;;  %p966_p9 = scmp.lt.s32.totalorder %s1252_s14, %s1297_s2 }
 0x45c   : > { %p967_p10 = scmp.lt.s32.totalorder %s965_s26, %s961_s23 }
 0x45d   : > { %p963_p7 = pnand %p962_p4, %p1069_p5 }
 0x45e   : > { %p968_p11 = por %p967_p10, %p966_p9 }
 0x45f   : > { %p964_p8 = pneg %p963_p7 }
 0x461   : > { %p969_p12 = pnand %p968_p11, %p964_p8 }
 0x463   : > { %972 = shalt.err (!%p969_p12)
}
 0x464   : > { %s1014_s30 = smov 128   ;;  %s1015_s6 = smov 8  }
 0x465   : > { %822 = dma.vmem_to_hbm [thread:$0]  (%p1069_p5), %s1247_s4, 256, %s1252_s14, %s1255_s16, %s1014_s30, %s1014_s30, %s1015_s6  }
 0x466 PF: > { %p828_p13 = scmp.ge.s32.totalorder %s1007_s12, 2  ;;  %s695_s29 = sand.u32 1, %s995_s9  }
 0x467   : > { %s696_s3 = scalar_lea.sflag [#allocation3], %s695_s29 }
 0x468   : > { %p825_p0 = pnand %p828_p13, %p1073_p6 }
 0x46a   : > { %p826_p1 = pneg %p825_p0 }
 0x46c   : > { %990 = dma.done.wait (%p826_p1), %s696_s3, 256  }
 0x46d   : > { %992 = vsyncadd (%p826_p1), %s696_s3, 4294967040  ;;  %p12_p2 = scmp.ge.s32.totalorder %s1056_s15, 4   ;;  %s1300_s9 = smov %s999_s10 }
 0x46e   : > { %s1301_s10 = smov %s1003_s11  ;;  %s1302_s11 = smov %s1067_s18 }
 0x46f   : > { %s1303_s12 = smov %s1056_s15  ;;  %14 = sbr.rel (!%p12_p2) target bundleno = 3 (0x3), region = 63 }
 0x474   :  { %701 = vsyncpa [#allocation3], 1 }
 0x475   :  { %703 = vsyncpa [#allocation3 + $0x1], 1 }

</bundles_post_ra>
